<compile_context>
chip_gen: v6e
topology: v6e:2x2x1
jax: 0.10.0
libtpu: 0.0.40
codegen_flags: <defaults>
</compile_context>

<pallas_src>
import math

import jax
import jax.numpy as jnp
import numpy as np
from jax.experimental import pallas as pl
from jax.experimental.pallas import tpu as pltpu


# --------------------------------------------------------------------------
# Kernel 1: fused QKV projection (one grid step projects all three inputs).
# --------------------------------------------------------------------------
def _qkv_proj_kernel(q_ref, k_ref, v_ref, wq_ref, wk_ref, wv_ref,
                     qo_ref, ko_ref, vo_ref):
    # *_ref activations: (ST, D) bf16; w*_ref: (D, D) W^T bf16 (resident).
    qo_ref[...] = jnp.dot(q_ref[...], wq_ref[...],
                          preferred_element_type=jnp.float32).astype(qo_ref.dtype)
    ko_ref[...] = jnp.dot(k_ref[...], wk_ref[...],
                          preferred_element_type=jnp.float32).astype(ko_ref.dtype)
    vo_ref[...] = jnp.dot(v_ref[...], wv_ref[...],
                          preferred_element_type=jnp.float32).astype(vo_ref.dtype)


# --------------------------------------------------------------------------
# Kernel 2: flash-style MHA over head-groups + output projection.
# --------------------------------------------------------------------------
def _make_flash_mha_kernel(*, causal, G, dk, TQ, TK):
    def kernel(*args):
        if causal:
            (q_ref, k_ref, v_ref, wo_ref, o_ref,
             m_sc, l_sc, acc_sc, out_acc) = args
            bias_ref = None
        else:
            (bias_ref, q_ref, k_ref, v_ref, wo_ref, o_ref,
             m_sc, l_sc, acc_sc, out_acc) = args

        qi = pl.program_id(1)
        hg = pl.program_id(2)
        ki = pl.program_id(3)
        nhg = pl.num_programs(2)
        nk = pl.num_programs(3)

        # Fresh online-softmax state for every (batch, q-tile, head-group).
        @pl.when(ki == 0)
        def _():
            m_sc[...] = jnp.full_like(m_sc, -jnp.inf)
            l_sc[...] = jnp.zeros_like(l_sc)
            acc_sc[...] = jnp.zeros_like(acc_sc)

        # Fresh output accumulator once per (batch, q-tile).
        @pl.when(jnp.logical_and(hg == 0, ki == 0))
        def _():
            out_acc[...] = jnp.zeros_like(out_acc)

        def body():
            if causal:
                rows = qi * TQ + jax.lax.broadcasted_iota(jnp.int32, (TQ, TK), 0)
                cols = ki * TK + jax.lax.broadcasted_iota(jnp.int32, (TQ, TK), 1)
                bias = jnp.where(cols <= rows,
                                 jnp.float32(0.0), jnp.float32(-1e9))
            else:
                bias = bias_ref[...]

            q_blk = q_ref[...]          # (TQ, G*dk) bf16 (scale folded into Wq)
            k_blk = k_ref[...]          # (TK, G*dk) bf16
            v_blk = v_ref[...]          # (TK, G*dk) bf16

            for g in range(G):          # unrolled per-head loop (static slices)
                lo, hi = g * dk, (g + 1) * dk
                q_h = q_blk[:, lo:hi]
                k_h = k_blk[:, lo:hi]
                v_h = v_blk[:, lo:hi]

                # Contract last dims of q and k (no explicit transpose).
                s = jax.lax.dot_general(
                    q_h, k_h, dimension_numbers=(((1,), (1,)), ((), ())),
                    preferred_element_type=jnp.float32)          # (TQ, TK) f32
                s = s + bias

                m_prev = m_sc[g]                                   # (TQ, 1)
                m_new = jnp.maximum(m_prev, jnp.max(s, axis=-1, keepdims=True))
                alpha = jnp.exp(m_prev - m_new)
                p = jnp.exp(s - m_new)                             # (TQ, TK) f32
                l_sc[g] = alpha * l_sc[g] + jnp.sum(p, axis=-1, keepdims=True)
                acc_sc[g] = alpha * acc_sc[g] + jnp.dot(
                    p.astype(v_h.dtype), v_h,
                    preferred_element_type=jnp.float32)            # (TQ, dk)
                m_sc[g] = m_new

        if causal:
            # Skip KV tiles that are entirely above the diagonal.
            tile_live = ki * TK <= qi * TQ + (TQ - 1)
            pl.when(tile_live)(body)
        else:
            body()

        # Last KV tile of this head-group: normalize (EUP reciprocal) and
        # fold this group's (G*dk, D) slice of Wo^T into the output acc.
        @pl.when(ki == nk - 1)
        def _():
            xs = [acc_sc[g] * pl.reciprocal(l_sc[g], approx=True)
                  for g in range(G)]
            x_grp = jnp.concatenate(xs, axis=-1).astype(wo_ref.dtype)  # (TQ, G*dk)
            out_acc[...] += jnp.dot(x_grp, wo_ref[...],
                                    preferred_element_type=jnp.float32)

        # Single lane-dense write of the (TQ, D) output block.
        @pl.when(jnp.logical_and(hg == nhg - 1, ki == nk - 1))
        def _():
            o_ref[...] = out_acc[...].astype(o_ref.dtype)

    return kernel


# --------------------------------------------------------------------------
# Wrapper
# --------------------------------------------------------------------------
def multihead_attention(q, k, v, mask, Wq, Wk, Wv, Wo, *, h, causal=False,
                        seq_block=256, q_block=128, kv_block=128,
                        compute_dtype=jnp.bfloat16):
    """Forward pass of the PyTorch MultiheadAttention module (eval mode).

    q, k, v: (B, S, D) float32; Wq applies to q, Wk to k, Wv to v (same math
             as `module.forward(k, q, v, mask)`).
    mask:    (S, S) int32, broadcast over batch/heads (0 -> masked). Ignored
             (may be None) when `causal=True`, in which case the standard
             lower-triangular mask is generated inside the kernel.
    W*:      (D, D) float32 in nn.Linear (out, in) convention, y = x @ W.T.
    """
    B, S, D = q.shape
    assert D % h == 0, "d_model is not divisible by h"
    dk = D // h
    assert D % 128 == 0, "d_model must be a multiple of 128 for lane tiling"

    # Head-grouping: process G heads (G*dk == 128 lanes) per grid step.
    if dk < 128:
        assert 128 % dk == 0 and h % (128 // dk) == 0, \
            "head grouping requires dk | 128 and (128//dk) | h"
        G = 128 // dk
    else:
        assert dk % 128 == 0, "dk must be a multiple of 128 when dk >= 128"
        G = 1
    HD = G * dk                      # lanes per head-group block
    HG = h // G                      # number of head-groups

    ST = min(seq_block, S)
    TQ = min(q_block, S)
    TK = min(kv_block, S)
    assert S % ST == 0 and S % TQ == 0 and S % TK == 0

    scale = 1.0 / math.sqrt(dk)

    # nn.Linear: y = x @ W.T.  Fold the attention scale into Wq^T.
    wq_t = (Wq.T * scale).astype(compute_dtype)
    wk_t = Wk.T.astype(compute_dtype)
    wv_t = Wv.T.astype(compute_dtype)
    wo_t = Wo.T.astype(compute_dtype)

    qc = q.astype(compute_dtype)
    kc = k.astype(compute_dtype)
    vc = v.astype(compute_dtype)

    # ---- Kernel 1: fused QKV projection (no stacking / extra HBM pass) ----
    proj_shape = jax.ShapeDtypeStruct((B, S, D), compute_dtype)
    x_spec = pl.BlockSpec((None, ST, D), lambda b, si: (b, si, 0))
    w_spec = pl.BlockSpec((D, D), lambda b, si: (0, 0))

    qp, kp, vp = pl.pallas_call(
        _qkv_proj_kernel,
        out_shape=(proj_shape, proj_shape, proj_shape),
        grid=(B, S // ST),
        in_specs=[x_spec, x_spec, x_spec, w_spec, w_spec, w_spec],
        out_specs=(x_spec, x_spec, x_spec),
        compiler_params=pltpu.CompilerParams(
            dimension_semantics=("parallel", "parallel")),
    )(qc, kc, vc, wq_t, wk_t, wv_t)

    # ---- Kernel 2: flash attention over head-groups + output projection ---
    grid = (B, S // TQ, HG, S // TK)

    q_spec = pl.BlockSpec((None, TQ, HD), lambda b, qi, hg, ki: (b, qi, hg))
    kv_spec = pl.BlockSpec((None, TK, HD), lambda b, qi, hg, ki: (b, ki, hg))
    wo_spec = pl.BlockSpec((HD, D), lambda b, qi, hg, ki: (hg, 0))
    out_spec = pl.BlockSpec((None, TQ, D), lambda b, qi, hg, ki: (b, qi, 0))

    in_specs = [q_spec, kv_spec, kv_spec, wo_spec]
    operands = [qp, kp, vp, wo_t]
    if not causal:
        bias = jnp.where(mask == 0, jnp.float32(-1e9), jnp.float32(0.0))  # (S, S)
        in_specs = [pl.BlockSpec((TQ, TK),
                                 lambda b, qi, hg, ki: (qi, ki))] + in_specs
        operands = [bias] + operands

    kernel = _make_flash_mha_kernel(causal=causal, G=G, dk=dk, TQ=TQ, TK=TK)

    out = pl.pallas_call(
        kernel,
        out_shape=jax.ShapeDtypeStruct((B, S, D), jnp.float32),
        grid_spec=pltpu.PrefetchScalarGridSpec(
            num_scalar_prefetch=0,
            grid=grid,
            in_specs=in_specs,
            out_specs=out_spec,
            scratch_shapes=[
                pltpu.VMEM((G, TQ, 1), jnp.float32),    # running max per head
                pltpu.VMEM((G, TQ, 1), jnp.float32),    # running denom per head
                pltpu.VMEM((G, TQ, dk), jnp.float32),   # un-normalized p@v acc
                pltpu.VMEM((TQ, D), jnp.float32),       # (TQ, D) output acc
            ],
        ),
        compiler_params=pltpu.CompilerParams(
            dimension_semantics=("parallel", "parallel",
                                 "arbitrary", "arbitrary")),
    )(*operands)
    return out


# --------------------------------------------------------------------------
# Plain-JAX reference (mirrors the PyTorch forward, eval mode).
# --------------------------------------------------------------------------
def _reference(q, k, v, mask, Wq, Wk, Wv, Wo, h, compute_dtype=jnp.bfloat16):
    """Inputs/weights are rounded to the kernel's compute dtype so the
    comparison against the bf16-MXU kernel path is apples-to-apples."""
    B, S, D = q.shape
    dk = D // h
    r = lambda a: a.astype(compute_dtype).astype(jnp.float32)
    qp = r(r(q) @ r(Wq).T)
    kp = r(r(k) @ r(Wk).T)
    vp = r(r(v) @ r(Wv).T)
    qh = qp.reshape(B, S, h, dk).transpose(0, 2, 1, 3)
    kh = kp.reshape(B, S, h, dk).transpose(0, 2, 1, 3)
    vh = vp.reshape(B, S, h, dk).transpose(0, 2, 1, 3)
    scores = jnp.einsum('bhqd,bhkd->bhqk', qh, kh) / math.sqrt(dk)
    scores = jnp.where(mask[None, None] == 0, -1e9, scores)
    probs = jax.nn.softmax(scores, axis=-1)
    x = jnp.einsum('bhqk,bhkd->bhqd', probs, vh)
    x = x.transpose(0, 2, 1, 3).reshape(B, S, D)
    return r(x) @ r(Wo).T


if __name__ == "__main__":
    # Small-but-tileable config: batch=2, seq=256, d_model=128, heads=4 (dk=32).
    B, S, D, H = 2, 256, 128, 4

    key = jax.random.PRNGKey(0)
    kq, kk, kv, kwq, kwk, kwv, kwo = jax.random.split(key, 7)

    q = jax.random.normal(kq, (B, S, D), dtype=jnp.float32)
    k = jax.random.normal(kk, (B, S, D), dtype=jnp.float32)
    v = jax.random.normal(kv, (B, S, D), dtype=jnp.float32)

    # Deterministic nn.Linear-style uniform init (bias=False).
    bound = 1.0 / math.sqrt(D)
    Wq = jax.random.uniform(kwq, (D, D), jnp.float32, -bound, bound)
    Wk = jax.random.uniform(kwk, (D, D), jnp.float32, -bound, bound)
    Wv = jax.random.uniform(kwv, (D, D), jnp.float32, -bound, bound)
    Wo = jax.random.uniform(kwo, (D, D), jnp.float32, -bound, bound)

    # Causal mask (S, S): 1 = attend, 0 = masked.
    mask = jnp.tril(jnp.ones((S, S), dtype=jnp.int32))

    ref = _reference(q, k, v, mask, Wq, Wk, Wv, Wo, H)

    # Fast path: in-kernel causal mask + masked-tile skipping.
    out_causal = multihead_attention(q, k, v, mask, Wq, Wk, Wv, Wo,
                                     h=H, causal=True)
    out_causal = jax.block_until_ready(out_causal)
    np.testing.assert_allclose(np.asarray(out_causal), np.asarray(ref),
                               atol=2e-2, rtol=2e-2)

    # General path: arbitrary (S, S) mask streamed as an additive bias tile.
    out_general = multihead_attention(q, k, v, mask, Wq, Wk, Wv, Wo,
                                      h=H, causal=False)
    out_general = jax.block_until_ready(out_general)
    np.testing.assert_allclose(np.asarray(out_general), np.asarray(ref),
                               atol=2e-2, rtol=2e-2)

    print("KERNEL_OK")
</pallas_src>

<mosaic_0001>
module attributes {stable_mosaic.version = 11 : i64} {
  func.func @_qkv_proj_kernel(%arg0: i32, %arg1: i32, %arg2: memref<1x256x128xbf16, #tpu.memory_space<vmem>>, %arg3: memref<1x256x128xbf16, #tpu.memory_space<vmem>>, %arg4: memref<1x256x128xbf16, #tpu.memory_space<vmem>>, %arg5: memref<128x128xbf16, #tpu.memory_space<vmem>>, %arg6: memref<128x128xbf16, #tpu.memory_space<vmem>>, %arg7: memref<128x128xbf16, #tpu.memory_space<vmem>>, %arg8: memref<1x256x128xbf16, #tpu.memory_space<vmem>>, %arg9: memref<1x256x128xbf16, #tpu.memory_space<vmem>>, %arg10: memref<1x256x128xbf16, #tpu.memory_space<vmem>>) attributes {dimension_semantics = [#tpu.dimension_semantics<parallel>, #tpu.dimension_semantics<parallel>], iteration_bounds = array<i64: 2, 1>, scalar_prefetch = 0 : i64, scratch_operands = 0 : i64, tpu.core_type = #tpu.core_type<tc>, window_params = [{transform_indices = @transform_0, window_bounds = array<i64: 1, 256, 128>}, {transform_indices = @transform_1, window_bounds = array<i64: 1, 256, 128>}, {transform_indices = @transform_2, window_bounds = array<i64: 1, 256, 128>}, {pipeline_mode = #tpu.pipeline_mode<synchronous>, transform_indices = @transform_3, window_bounds = array<i64: 128, 128>}, {pipeline_mode = #tpu.pipeline_mode<synchronous>, transform_indices = @transform_4, window_bounds = array<i64: 128, 128>}, {pipeline_mode = #tpu.pipeline_mode<synchronous>, transform_indices = @transform_5, window_bounds = array<i64: 128, 128>}, {transform_indices = @transform_6, window_bounds = array<i64: 1, 256, 128>}, {transform_indices = @transform_7, window_bounds = array<i64: 1, 256, 128>}, {transform_indices = @transform_8, window_bounds = array<i64: 1, 256, 128>}]} {
    %c0 = arith.constant 0 : index
    %c0_0 = arith.constant 0 : index
    %c0_1 = arith.constant 0 : index
    %0 = vector.load %arg2[%c0, %c0_0, %c0_1] : memref<1x256x128xbf16, #tpu.memory_space<vmem>>, vector<1x256x128xbf16>
    %1 = vector.shape_cast %0 : vector<1x256x128xbf16> to vector<256x128xbf16>
    %c0_2 = arith.constant 0 : index
    %c0_3 = arith.constant 0 : index
    %2 = vector.load %arg5[%c0_2, %c0_3] : memref<128x128xbf16, #tpu.memory_space<vmem>>, vector<128x128xbf16>
    %cst = arith.constant dense<0.000000e+00> : vector<256x128xf32>
    %3 = tpu.matmul %1, %2, %cst {dimension_numbers = #tpu.dot_dimension_numbers<[1], [0], [0], [1], [0, 0, 1, 1], [], []>} : vector<256x128xbf16>, vector<128x128xbf16>, vector<256x128xf32> -> vector<256x128xf32>
    %4 = arith.truncf %3 : vector<256x128xf32> to vector<256x128xbf16>
    %c0_4 = arith.constant 0 : index
    %c0_5 = arith.constant 0 : index
    %c0_6 = arith.constant 0 : index
    %5 = vector.load %arg8[%c0_4, %c0_5, %c0_6] : memref<1x256x128xbf16, #tpu.memory_space<vmem>>, vector<1x256x128xbf16>
    %6 = vector.shape_cast %5 : vector<1x256x128xbf16> to vector<256x128xbf16>
    %7 = vector.shape_cast %4 : vector<256x128xbf16> to vector<1x256x128xbf16>
    tpu.vector_store %arg8[%c0_4, %c0_5, %c0_6], %7 {strides = array<i32>} : memref<1x256x128xbf16, #tpu.memory_space<vmem>>, vector<1x256x128xbf16>,
    %c0_7 = arith.constant 0 : index
    %c0_8 = arith.constant 0 : index
    %c0_9 = arith.constant 0 : index
    %8 = vector.load %arg3[%c0_7, %c0_8, %c0_9] : memref<1x256x128xbf16, #tpu.memory_space<vmem>>, vector<1x256x128xbf16>
    %9 = vector.shape_cast %8 : vector<1x256x128xbf16> to vector<256x128xbf16>
    %c0_10 = arith.constant 0 : index
    %c0_11 = arith.constant 0 : index
    %10 = vector.load %arg6[%c0_10, %c0_11] : memref<128x128xbf16, #tpu.memory_space<vmem>>, vector<128x128xbf16>
    %cst_12 = arith.constant dense<0.000000e+00> : vector<256x128xf32>
    %11 = tpu.matmul %9, %10, %cst_12 {dimension_numbers = #tpu.dot_dimension_numbers<[1], [0], [0], [1], [0, 0, 1, 1], [], []>} : vector<256x128xbf16>, vector<128x128xbf16>, vector<256x128xf32> -> vector<256x128xf32>
    %12 = arith.truncf %11 : vector<256x128xf32> to vector<256x128xbf16>
    %c0_13 = arith.constant 0 : index
    %c0_14 = arith.constant 0 : index
    %c0_15 = arith.constant 0 : index
    %13 = vector.load %arg9[%c0_13, %c0_14, %c0_15] : memref<1x256x128xbf16, #tpu.memory_space<vmem>>, vector<1x256x128xbf16>
    %14 = vector.shape_cast %13 : vector<1x256x128xbf16> to vector<256x128xbf16>
    %15 = vector.shape_cast %12 : vector<256x128xbf16> to vector<1x256x128xbf16>
    tpu.vector_store %arg9[%c0_13, %c0_14, %c0_15], %15 {strides = array<i32>} : memref<1x256x128xbf16, #tpu.memory_space<vmem>>, vector<1x256x128xbf16>,
    %c0_16 = arith.constant 0 : index
    %c0_17 = arith.constant 0 : index
    %c0_18 = arith.constant 0 : index
    %16 = vector.load %arg4[%c0_16, %c0_17, %c0_18] : memref<1x256x128xbf16, #tpu.memory_space<vmem>>, vector<1x256x128xbf16>
    %17 = vector.shape_cast %16 : vector<1x256x128xbf16> to vector<256x128xbf16>
    %c0_19 = arith.constant 0 : index
    %c0_20 = arith.constant 0 : index
    %18 = vector.load %arg7[%c0_19, %c0_20] : memref<128x128xbf16, #tpu.memory_space<vmem>>, vector<128x128xbf16>
    %cst_21 = arith.constant dense<0.000000e+00> : vector<256x128xf32>
    %19 = tpu.matmul %17, %18, %cst_21 {dimension_numbers = #tpu.dot_dimension_numbers<[1], [0], [0], [1], [0, 0, 1, 1], [], []>} : vector<256x128xbf16>, vector<128x128xbf16>, vector<256x128xf32> -> vector<256x128xf32>
    %20 = arith.truncf %19 : vector<256x128xf32> to vector<256x128xbf16>
    %c0_22 = arith.constant 0 : index
    %c0_23 = arith.constant 0 : index
    %c0_24 = arith.constant 0 : index
    %21 = vector.load %arg10[%c0_22, %c0_23, %c0_24] : memref<1x256x128xbf16, #tpu.memory_space<vmem>>, vector<1x256x128xbf16>
    %22 = vector.shape_cast %21 : vector<1x256x128xbf16> to vector<256x128xbf16>
    %23 = vector.shape_cast %20 : vector<256x128xbf16> to vector<1x256x128xbf16>
    tpu.vector_store %arg10[%c0_22, %c0_23, %c0_24], %23 {strides = array<i32>} : memref<1x256x128xbf16, #tpu.memory_space<vmem>>, vector<1x256x128xbf16>,
    return
  }
  func.func @transform_0(%arg0: i32, %arg1: i32) -> (i32, i32, i32) {
    %c0_i32 = arith.constant 0 : i32
    %c0_i32_0 = arith.constant 0 : i32
    return %arg0, %arg1, %c0_i32 : i32, i32, i32
  }
  func.func @transform_1(%arg0: i32, %arg1: i32) -> (i32, i32, i32) {
    %c0_i32 = arith.constant 0 : i32
    %c0_i32_0 = arith.constant 0 : i32
    return %arg0, %arg1, %c0_i32 : i32, i32, i32
  }
  func.func @transform_2(%arg0: i32, %arg1: i32) -> (i32, i32, i32) {
    %c0_i32 = arith.constant 0 : i32
    %c0_i32_0 = arith.constant 0 : i32
    return %arg0, %arg1, %c0_i32 : i32, i32, i32
  }
  func.func @transform_3(%arg0: i32, %arg1: i32) -> (i32, i32) {
    %c0_i32 = arith.constant 0 : i32
    %c0_i32_0 = arith.constant 0 : i32
    %c0_i32_1 = arith.constant 0 : i32
    return %c0_i32, %c0_i32_0 : i32, i32
  }
  func.func @transform_4(%arg0: i32, %arg1: i32) -> (i32, i32) {
    %c0_i32 = arith.constant 0 : i32
    %c0_i32_0 = arith.constant 0 : i32
    %c0_i32_1 = arith.constant 0 : i32
    return %c0_i32, %c0_i32_0 : i32, i32
  }
  func.func @transform_5(%arg0: i32, %arg1: i32) -> (i32, i32) {
    %c0_i32 = arith.constant 0 : i32
    %c0_i32_0 = arith.constant 0 : i32
    %c0_i32_1 = arith.constant 0 : i32
    return %c0_i32, %c0_i32_0 : i32, i32
  }
  func.func @transform_6(%arg0: i32, %arg1: i32) -> (i32, i32, i32) {
    %c0_i32 = arith.constant 0 : i32
    %c0_i32_0 = arith.constant 0 : i32
    return %arg0, %arg1, %c0_i32 : i32, i32, i32
  }
  func.func @transform_7(%arg0: i32, %arg1: i32) -> (i32, i32, i32) {
    %c0_i32 = arith.constant 0 : i32
    %c0_i32_0 = arith.constant 0 : i32
    return %arg0, %arg1, %c0_i32 : i32, i32, i32
  }
  func.func @transform_8(%arg0: i32, %arg1: i32) -> (i32, i32, i32) {
    %c0_i32 = arith.constant 0 : i32
    %c0_i32_0 = arith.constant 0 : i32
    return %arg0, %arg1, %c0_i32 : i32, i32, i32
  }
}

</mosaic_0001>

<bundles_post_ra>
// kernel: tpu_custom_call.1
= control target key start
LH: loop header
LB: loop body
LE: loop exit
PB: predicated region body
PF: predicated region fallthrough
CT: control target
= control target key end

     0   :  { %s4180_s0 = inlined_call_operand.hbm [shape: bf16[2,256,128], index: 0, kind: input, shape index: {}]   ;;  %s4181_s1 = inlined_call_operand.hbm [shape: bf16[2,256,128], index: 1, kind: input, shape index: {}]   ;;  %s4182_s2 = inlined_call_operand.hbm [shape: bf16[2,256,128], index: 2, kind: input, shape index: {}]   ;;  %s4183_s3 = inlined_call_operand.hbm [shape: bf16[128,128], index: 3, kind: input, shape index: {}]   ;;  %s4184_s4 = inlined_call_operand.hbm [shape: bf16[128,128], index: 4, kind: input, shape index: {}]   ;;  %s4185_s5 = inlined_call_operand.hbm [shape: bf16[128,128], index: 5, kind: input, shape index: {}]   ;;  %s4186_s6 = inlined_call_operand.hbm [shape: bf16[2,256,128], index: 6, kind: output, shape index: {0}]   ;;  %s4187_s7 = inlined_call_operand.hbm [shape: bf16[2,256,128], index: 7, kind: output, shape index: {1}]   ;;  %s4188_s8 = inlined_call_operand.hbm [shape: bf16[2,256,128], index: 8, kind: output, shape index: {2}]  }
   0x1   :  { %4205 = sst [smem:[#allocation27_spill]] %s4181_s1 }
   0x2   :  { %4206 = sst [smem:[#allocation28_spill]] %s4183_s3 }
   0x3   :  { %4207 = sst [smem:[#allocation29_spill]] %s4184_s4 }
   0x4   :  { %4208 = sst [smem:[#allocation30_spill]] %s4187_s7 }
   0x5   :  { %4209 = sst [smem:[#allocation31_spill]] %s4188_s8 }
   0x6   :  { %14 = vsyncpa [#allocation3], 0 }
   0x7   :  { %16 = vsyncpa [#allocation3 + $0x1], 0 }
   0x8   :  { %17 = vsyncpa [#allocation6], 0 }
   0x9   :  { %19 = vsyncpa [#allocation6 + $0x1], 0 }
   0xa   :  { %20 = vsyncpa [#allocation9], 0 }
   0xb   :  { %21 = vsyncpa [#allocation12], 0 }
   0xc   :  { %22 = vsyncpa [#allocation4], 0 }
   0xd   :  { %24 = vsyncpa [#allocation4 + $0x1], 0 }
   0xe   :  { %25 = vsyncpa [#allocation15], 0 }
   0xf   :  { %27 = vsyncpa [#allocation15 + $0x1], 0  ;;  %s3716_s27 = smov 0   ;;  %s3718_s28 = smov 0  }
  0x10   :  { %s3720_s29 = smov 0   ;;  %s3722_s30 = smov 0  }
  0x11   :  { %s3724_s9 = smov 0   ;;  %s3726_s10 = smov 0  }
  0x12 LB: > { %4210 = sst [smem:[#allocation23_spill]] %s3636_s27  ;;  %s3747_s11 = sadd.s32 4294967295, %s3656_s10   ;;  %s3656_s10 = sphi %s3726_s10, %s33_s10   ;;  %s3652_s9 = sphi %s3724_s9, %s4245_s9   ;;  %s3648_s30 = sphi %s3722_s30, %s4244_s30   ;;  %s3644_s29 = sphi %s3720_s29, %s4248_s29   ;;  %s3640_s28 = sphi %s3718_s28, %s4247_s28   ;;  %s3636_s27 = sphi %s3716_s27, %s4246_s27  }
  0x13   : > { %4211 = sst [smem:[#allocation24_spill]] %s3652_s9  ;;  %s4190_s12 = sadd.s32 4294967294, %s3656_s10  }
  0x14   : > { %p61_p0 = scmp.ne.s32.totalorder %s3644_s29, %s3640_s28  ;;  %p62_p1 = scmp.eq.s32.totalorder %s3656_s10, 0 }
  0x15   : > { %p67_p2 = scmp.ne.s32.totalorder %s3640_s28, %s3636_s27  ;;  %p4189_p3 = scmp.eq.s32.totalorder %s3747_s11, 0 }
  0x16   : > { %p3756_p4 = por %p62_p1, %p61_p0  ;;  %p212_p5 = scmp.eq.s32.totalorder %s3747_s11, 1 }
  0x17   : > { %p3763_p6 = por %p4189_p3, %p67_p2  ;;  %p218_p7 = scmp.eq.s32.totalorder %s4190_s12, 1 }
  0x18   : > { %p3769_p8 = por %p212_p5, %p61_p0  ;;  %p2335_p9 = scmp.ge.s32.totalorder %s3656_s10, 1 }
  0x19   : > { %s4213_s14 = scalar_select %p3763_p6, 1, 0 }
  0x1a   : > { %s4214_s15 = scalar_select %p3769_p8, 1, 0 }
  0x1b   : > { %p3774_p10 = por %p218_p7, %p67_p2  ;;  %p281_p11 = scmp.lt.s32.totalorder %s3656_s10, 3 }
  0x1c   : > { %s3658_s18 = smov [#allocation8]   ;;  %s45_s21 = sadd.s32 1, %s3652_s9 }
  0x1d   : > { %s4215_s16 = scalar_select %p3774_p10, 1, 0 }
  0x1e   : > { %p3779_p12 = pnand %p2335_p9, %p281_p11  ;;  %s293_s19 = sshll.u32 %s3658_s18, 4  ;;  %s294_s19 = int_to_ptr.vmem [resolvable:$true] %s293_s19 }
  0x1f   : > { %4216 = sst [smem:[#allocation25_spill]] %s4215_s16  ;;  %s54_s22 = sadd.s32 1, %s3644_s29 }
  0x20   : > { %p3181_p13 = pneg %p3779_p12  ;;  %p3794_p2 = scmp.ge.s32.totalorder %s45_s21, 2 }
  0x21   : > { %s3357_s24 = scalar_lea.vmem %s294_s19, 1024 }
  0x22   : > { %p3788_p1 = pnand %p3181_p13, %p4189_p3  ;;  %p3358_p7 = scmp.ne.s32.totalorder %s294_s19, %s3357_s24 }
  0x23   : > { %p3365_p13 = scmp.lt.s32.totalorder %s294_s19, %s294_s19  ;;  %p3366_p0 = scmp.lt.s32.totalorder %s3357_s24, %s3357_s24 }
  0x24   : > { %p3348_p5 = pneg %p3788_p1 }
  0x25   : > { %p3367_p3 = por %p3366_p0, %p3365_p13 }
  0x26   : > { %p3360_p9 = pnand %p3358_p7, %p3348_p5 }
  0x28   : > { %p3361_p11 = pneg %p3360_p9 }
  0x2a   : > { %p3368_p10 = pnand %p3367_p3, %p3361_p11 }
  0x2c   : > { %3371 = shalt.err (!%p3368_p10)
}
  0x2d   : > { %s4196_s25 = smov 64   ;;  %s4198_s26 = smov 4  }
  0x2e   : > { %s4220_s3 = sld [smem:[#allocation28_spill]]  ;;  %s4250_s21 = smov (%p3794_p2, %s45_s21), 0 }
  0x2f   : > { %4221 = sst [smem:[#allocation26_spill]] %s4250_s21  ;;  %p3214_p3 = scmp.lt.s32.totalorder %s3656_s10, 2 }
  0x30   : > { %s4195_s12 = sand.u32 1, %s3644_s29   ;;  %s49_s16 = ssub.s32 %s3652_s9, %s4250_s21 }
  0x31   : > { %s3821_s27 = sshll.u32 %s4195_s12, 7  ;;  %p52_p10 = scmp.eq.s32.totalorder %s49_s16, 0 }
  0x32   : > { %s3824_s8 = sshll.u32 %s3652_s9, 11  ;;  %p3828_p0 = pnand %p3214_p3, %p3756_p4 }
  0x33   : > { %s3834_s23 = scalar_select %p52_p10, %s3644_s29, %s54_s22  }
  0x34   : > { %3184 = dma.hbm_to_vmem [thread:$0]  (!%p3788_p1), %s4220_s3, 1024, %s294_s19, [#allocation9], %s4196_s25, %s4196_s25, %s4198_s26  }
  0x35   : > { %s356_s19 = sand.u32 1, %s3656_s10   ;;  %s4223_s1 = sld [smem:[#allocation27_spill]] }
  0x36   : > { %s360_s25 = scalar_lea.vmem [#allocation5], %s3821_s27  ;;  %s3661_s16 = smov [#allocation10]  }
  0x37   : > { %s369_s26 = sshll.u32 %s360_s25, 4  ;;  %s306_s3 = sshll.u32 %s3661_s16, 4  ;;  %s370_s26 = int_to_ptr.vmem [resolvable:$true] %s369_s26  ;;  %s307_s3 = int_to_ptr.vmem [resolvable:$true] %s306_s3 }
  0x38   : > { %s3841_s13 = scalar_lea.sflag [#allocation6], %s356_s19  ;;  %p4202_p4 = pneg %p3828_p0 }
  0x39   : > { %s3385_s21 = scalar_lea.vmem %s370_s26, 2048  ;;  %s3662_s22 = smov [#allocation5]  }
  0x3a   : > { %p3386_p2 = scmp.ne.s32.totalorder %s370_s26, %s3385_s21  ;;  %s3390_s9 = sshll.u32 %s3662_s22, 4  ;;  %s3391_s9 = int_to_ptr.vmem [resolvable:$false] %s3390_s9 }
  0x3b   : > { %s368_s12 = scalar_lea.hbm %s4223_s1, %s3824_s8  ;;  %s3392_s18 = scalar_lea.vmem %s3391_s9, 4096 }
  0x3c   : > { %p3388_p7 = pnand %p3386_p2, %p4202_p4  ;;  %p3393_p11 = scmp.lt.s32.totalorder %s370_s26, %s3391_s9 }
  0x3d   : > { %p3394_p13 = scmp.lt.s32.totalorder %s3392_s18, %s3385_s21 }
  0x3e   : > { %p3389_p9 = pneg %p3388_p7 }
  0x3f   : > { %p3395_p3 = por %p3394_p13, %p3393_p11 }
  0x41   : > { %p3396_p10 = pnand %p3395_p3, %p3389_p9 }
  0x43   : > { %3399 = shalt.err (!%p3396_p10)
}
  0x44   : > { %s4224_s25 = smov 4   ;;  %s4225_s19 = smov 64  }
  0x45   : > { %3197 = dma.hbm_to_vmem [thread:$0]  (!%p3828_p0), %s368_s12, 2048, %s370_s26, %s3841_s13, %s4225_s19, %s4225_s19, %s4224_s25  }
  0x46   : > { %s3411_s24 = scalar_lea.vmem %s307_s3, 1024  ;;  %p3419_p8 = scmp.lt.s32.totalorder %s307_s3, %s307_s3 }
  0x47   : > { %p3412_p2 = scmp.ne.s32.totalorder %s307_s3, %s3411_s24  ;;  %p3420_p6 = scmp.lt.s32.totalorder %s3411_s24, %s3411_s24 }
  0x49   : > { %p3414_p7 = pnand %p3412_p2, %p3348_p5  ;;  %p3421_p11 = por %p3420_p6, %p3419_p8 }
  0x4b   : > { %p3415_p4 = pneg %p3414_p7 }
  0x4d   : > { %p3422_p9 = pnand %p3421_p11, %p3415_p4 }
  0x4f   : > { %3425 = shalt.err (!%p3422_p9)
}
  0x50   : > { %s4226_s4 = sld [smem:[#allocation29_spill]]  ;;  %s3663_s12 = smov [#allocation11]  }
  0x51   : > { %s319_s26 = sshll.u32 %s3663_s12, 4  ;;  %s320_s26 = int_to_ptr.vmem [resolvable:$true] %s319_s26 }
  0x52   : > { %s3437_s16 = scalar_lea.vmem %s320_s26, 1024  ;;  %p3445_p4 = scmp.lt.s32.totalorder %s320_s26, %s320_s26 }
  0x53   : > { %p3438_p13 = scmp.ne.s32.totalorder %s320_s26, %s3437_s16  ;;  %p3446_p3 = scmp.lt.s32.totalorder %s3437_s16, %s3437_s16 }
  0x55   : > { %p3440_p6 = pnand %p3438_p13, %p3348_p5  ;;  %p3447_p10 = por %p3446_p3, %p3445_p4 }
  0x56   : > { %3187 = dma.hbm_to_vmem [thread:$0]  (!%p3788_p1), %s4226_s4, 1024, %s307_s3, [#allocation9], %s4225_s19, %s4225_s19, %s4224_s25  }
  0x57   : > { %p3441_p8 = pneg %p3440_p6 }
  0x59   : > { %p3448_p2 = pnand %p3447_p10, %p3441_p8 }
  0x5b   : > { %3451 = shalt.err (!%p3448_p2)
}
  0x5c   : > { %3190 = dma.hbm_to_vmem [thread:$0]  (!%p3788_p1), %s4185_s5, 1024, %s320_s26, [#allocation12], %s4225_s19, %s4225_s19, %s4224_s25  }
  0x5d   : > { %s345_s9 = scalar_lea.hbm %s4180_s0, %s3824_s8  ;;  %s337_s21 = scalar_lea.vmem [#allocation2], %s3821_s27 }
  0x5e   : > { %s346_s12 = sshll.u32 %s337_s21, 4  ;;  %s4227_s16 = sand.u32 1, %s3644_s29   ;;  %s347_s12 = int_to_ptr.vmem [resolvable:$true] %s346_s12 }
  0x5f   : > { %s334_s20 = scalar_lea.sflag [#allocation3], %s4227_s16  ;;  %s3465_s1 = scalar_lea.vmem %s347_s12, 2048 }
  0x60   : > { %p3466_p5 = scmp.ne.s32.totalorder %s347_s12, %s3465_s1  ;;  %p4228_p7 = pneg %p3828_p0 }
  0x61   : > { %s3664_s3 = smov [#allocation2]  }
  0x62   : > { %p3468_p11 = pnand %p3466_p5, %p4228_p7  ;;  %s3470_s22 = sshll.u32 %s3664_s3, 4  ;;  %s3471_s22 = int_to_ptr.vmem [resolvable:$false] %s3470_s22 }
  0x63   : > { %s3472_s4 = scalar_lea.vmem %s3471_s22, 4096  ;;  %p3473_p1 = scmp.lt.s32.totalorder %s347_s12, %s3471_s22 }
  0x64   : > { %p3469_p9 = pneg %p3468_p11  ;;  %p3474_p13 = scmp.lt.s32.totalorder %s3472_s4, %s3465_s1 }
  0x66   : > { %p3475_p6 = por %p3474_p13, %p3473_p1 }
  0x68   : > { %p3476_p8 = pnand %p3475_p6, %p3469_p9 }
  0x6a   : > { %3479 = shalt.err (!%p3476_p8)
}
  0x6b   : > { %3194 = dma.hbm_to_vmem [thread:$0]  (!%p3828_p0), %s345_s9, 2048, %s347_s12, %s334_s20, %s4225_s19, %s4225_s19, %s4224_s25  }
  0x6c   : > { %s391_s24 = scalar_lea.hbm %s4182_s2, %s3824_s8  ;;  %s383_s21 = scalar_lea.vmem [#allocation7], %s3821_s27 }
  0x6d   : > { %s392_s16 = sshll.u32 %s383_s21, 4  ;;  %p4229_p3 = pmov %p4228_p7  ;;  %s393_s16 = int_to_ptr.vmem [resolvable:$true] %s392_s16 }
  0x6e   : > { %s3493_s1 = scalar_lea.vmem %s393_s16, 2048  ;;  %s3665_s4 = smov [#allocation7]  }
  0x6f   : > { %p3494_p4 = scmp.ne.s32.totalorder %s393_s16, %s3493_s1  ;;  %s3498_s3 = sshll.u32 %s3665_s4, 4  ;;  %s3499_s3 = int_to_ptr.vmem [resolvable:$false] %s3498_s3 }
  0x70   : > { %s3500_s22 = scalar_lea.vmem %s3499_s3, 4096  ;;  %p3501_p5 = scmp.lt.s32.totalorder %s393_s16, %s3499_s3 }
  0x71   : > { %p3496_p10 = pnand %p3494_p4, %p4229_p3  ;;  %p3502_p7 = scmp.lt.s32.totalorder %s3500_s22, %s3493_s1 }
  0x73   : > { %p3497_p2 = pneg %p3496_p10  ;;  %p3503_p11 = por %p3502_p7, %p3501_p5 }
  0x75   : > { %p3504_p9 = pnand %p3503_p11, %p3497_p2 }
  0x77   : > { %3507 = shalt.err (!%p3504_p9)
}
  0x78   : > { %3200 = dma.hbm_to_vmem [thread:$0]  (!%p3828_p0), %s391_s24, 2048, %s393_s16, %s3841_s13, %s4225_s19, %s4225_s19, %s4224_s25  }
  0x79   : > { %404 = sbr.rel (%p3779_p12) target bundleno = 503 (0x1f7), region = 44  ;;  %s3908_s8 = sand.u32 (!%p3779_p12), 1, %s3640_s28  }
  0x7a   : > { %s3911_s27 = sshll.u32 (!%p3779_p12), %s3908_s8, 7  ;;  %s407_s9 = scalar_lea.sflag (!%p3779_p12), [#allocation3], %s3908_s8 }
  0x7b   : > { %s3915_s12 = scalar_lea.vmem (!%p3779_p12), [#allocation2], %s3911_s27  ;;  %p4230_p1 = scmp.ne.s32.totalorder (!%p3779_p12), %s4213_s14, 0 }
  0x7e   : > { %3611 = dma.done.wait (%p4230_p1), %s407_s9, 2048  }
  0x7f   : > { %3613 = vsyncadd (%p4230_p1), %s407_s9, 4294965248  ;;  %s415_s7 = sand.u32 1, %s3747_s11   ;;  %s3925_s13 = scalar_lea.vmem [#allocation5], %s3911_s27 }
  0x80   : > { %s416_s17 = scalar_lea.sflag [#allocation6], %s415_s7 }
  0x81   : > { %3615 = dma.done.wait (%p4230_p1), %s416_s17, 4096  }
  0x82   : > { %3617 = vsyncadd (%p4230_p1), %s416_s17, 4294963200  ;;  %s3932_s25 = scalar_lea.vmem [#allocation7], %s3911_s27  ;;  %p4231_p12 = scmp.eq.s32.totalorder %s3747_s11, 0 }
  0x84   : > { %3619 = dma.done.wait (%p4231_p12), [#allocation9], 2048   ;;  %p4232_p0 = pmov %p4231_p12 }
  0x86   : > { %3621 = vsyncadd (%p4232_p0), [#allocation9], 4294965248  ;;  %p4233_p13 = pmov %p4232_p0 }
  0x87   : > { %p4234_p6 = pmov %p4232_p0 }
  0x88   : > { %3623 = dma.done.wait (%p4233_p13), [#allocation12], 1024  }
  0x89   : > { %3625 = vsyncadd (%p4234_p6), [#allocation12], 4294966272  ;;  %v3274_v0 = vld [vmem:[#allocation8 + $0x38] sm:$0xff]   ;;  %v3275_v1 = vld [vmem:[#allocation8 + $0x30] sm:$0xff]   ;;  %s3991_s14 = scalar_lea.vmem [#allocation13], %s3911_s27  ;;  %s4006_s19 = sshll.u32 %s3648_s30, 11 }
  0x8a   : > { %2997 = vmatprep.subr.bf16.mxu0 %v3274_v0  ;;  %3141 = vmatprep.subr.bf16.mxu1 %v3274_v0  ;;  %v3276_v2 = vld [vmem:[#allocation8 + $0x28] sm:$0xff]   ;;  %v3277_v3 = vld [vmem:[#allocation8 + $0x20] sm:$0xff]   ;;  %v3278_v6 = vld [vmem:[#allocation8 + $0x18] sm:$0xff]   ;;  %s2065_s20 = sshll.u32 %s3991_s14, 4  ;;  %s4015_s24 = scalar_lea.hbm %s4186_s6, %s4006_s19  ;;  %s4017_s20 = int_to_ptr.vmem [resolvable:$true] %s2065_s20 }
  0x8b   : > { %2998 = vmatpush3.bf16.msra.mxu0 %v3274_v0  ;;  %3149 = vmatpush3.bf16.msra.mxu1 %v3274_v0  ;;  %v3282_v4 = vld [vmem:[%s3915_s12] sm:$0xff]   ;;  %v3279_v7 = vld [vmem:[#allocation8 + $0x10] sm:$0xff]   ;;  %v3280_v8 = vld [vmem:[#allocation8 + $0x8] sm:$0xff]   ;;  %s2040_s30 = scalar_lea.sflag [#allocation4], %s3908_s8  ;;  %s3508_s21 = scalar_lea.vmem %s4017_s20, 2048 }
  0x8c   : > { %2999 = vmatprep.subr.bf16.mxu0 %v3275_v1  ;;  %3142 = vmatprep.subr.bf16.mxu1 %v3275_v1  ;;  %v3283_v5 = vld [vmem:[%s3915_s12 + $0x40] sm:$0xff]   ;;  %v3286_v10 = vld [vmem:[#allocation10 + $0x38] sm:$0xff]   ;;  %v3284_v11 = vld [vmem:[%s3915_s12 + $0x8] sm:$0xff]   ;;  %p3509_p8 = scmp.ne.s32.totalorder %s4017_s20, %s3508_s21  ;;  %p4235_p4 = scmp.ne.s32.totalorder %s4214_s15, 0 }
  0x8d   : > { %3013 = vmatprep.mubr.bf16.mxu0 %v3282_v4  ;;  %3029 = vmatprep.mubr.bf16.mxu1 %v3283_v5  ;;  %v3281_v9 = vld [vmem:[#allocation8] sm:$0xff]   ;;  %v3287_v12 = vld [vmem:[#allocation11 + $0x38] sm:$0xff]   ;;  %v3285_v13 = vld [vmem:[%s3915_s12 + $0x48] sm:$0xff]   ;;  %s3666_s16 = smov [#allocation13]  }
  0x8e   : > { %v3288_v14 = vld [vmem:[#allocation10 + $0x30] sm:$0xff]   ;;  %v3294_v18 = vld [vmem:[#allocation10 + $0x28] sm:$0xff]   ;;  %v3292_v19 = vld [vmem:[%s3915_s12 + $0x18] sm:$0xff]   ;;  %p3510_p3 = pnand %p3509_p8, %p4235_p4  ;;  %s3512_s1 = sshll.u32 %s3666_s16, 4  ;;  %s3513_s1 = int_to_ptr.vmem [resolvable:$false] %s3512_s1 }
  0x8f   : > { %3000 = vmatpush3.bf16.msra.mxu0 %v3275_v1  ;;  %3150 = vmatpush3.bf16.msra.mxu1 %v3275_v1  ;;  %v3289_v15 = vld [vmem:[#allocation11 + $0x30] sm:$0xff]   ;;  %v3295_v20 = vld [vmem:[#allocation11 + $0x28] sm:$0xff]   ;;  %v3293_v21 = vld [vmem:[%s3915_s12 + $0x58] sm:$0xff]   ;;  %s3514_s4 = scalar_lea.vmem %s3513_s1, 4096  ;;  %p3515_p2 = scmp.lt.s32.totalorder %s4017_s20, %s3513_s1 }
  0x90   : > { %3001 = vmatprep.subr.bf16.mxu0 %v3276_v2  ;;  %3143 = vmatprep.subr.bf16.mxu1 %v3276_v2  ;;  %v3290_v16 = vld [vmem:[%s3915_s12 + $0x10] sm:$0xff]   ;;  %v3296_v22 = vld [vmem:[#allocation10 + $0x20] sm:$0xff]   ;;  %v3302_v26 = vld [vmem:[#allocation10 + $0x18] sm:$0xff]   ;;  %p3511_p10 = pneg %p3510_p3  ;;  %p3516_p5 = scmp.lt.s32.totalorder %s3514_s4, %s3508_s21 }
  0x91   : > { %v3291_v17 = vld [vmem:[%s3915_s12 + $0x50] sm:$0xff]   ;;  %v3297_v23 = vld [vmem:[#allocation11 + $0x20] sm:$0xff]   ;;  %v3300_v27 = vld [vmem:[%s3915_s12 + $0x28] sm:$0xff]  }
  0x92   : > { %v3298_v24 = vld [vmem:[%s3915_s12 + $0x20] sm:$0xff]   ;;  %v3303_v28 = vld [vmem:[#allocation11 + $0x18] sm:$0xff]   ;;  %v3301_v29 = vld [vmem:[%s3915_s12 + $0x68] sm:$0xff]   ;;  %p3517_p7 = por %p3516_p5, %p3515_p2 }
  0x93   : > { %3002 = vmatpush3.bf16.msra.mxu0 %v3276_v2  ;;  %3151 = vmatpush3.bf16.msra.mxu1 %v3276_v2  ;;  %v3299_v25 = vld [vmem:[%s3915_s12 + $0x60] sm:$0xff]   ;;  %v3304_v30 = vld [vmem:[#allocation10 + $0x10] sm:$0xff]   ;;  %v3310_v34 = vld [vmem:[#allocation10 + $0x8] sm:$0xff]  }
  0x94   : > { %3003 = vmatprep.subr.bf16.mxu0 %v3277_v3  ;;  %3144 = vmatprep.subr.bf16.mxu1 %v3277_v3  ;;  %v3305_v31 = vld [vmem:[#allocation11 + $0x10] sm:$0xff]   ;;  %v3308_v35 = vld [vmem:[%s3915_s12 + $0x38] sm:$0xff]   ;;  %v3311_v36 = vld [vmem:[#allocation11 + $0x8] sm:$0xff]   ;;  %p3518_p11 = pnand %p3517_p7, %p3511_p10 }
  0x95   : > { %v3306_v32 = vld [vmem:[%s3915_s12 + $0x30] sm:$0xff]   ;;  %v3309_v37 = vld [vmem:[%s3915_s12 + $0x78] sm:$0xff]   ;;  %v3312_v38 = vld [vmem:[#allocation10] sm:$0xff]  }
  0x96   : > { %v3307_v33 = vld [vmem:[%s3915_s12 + $0x70] sm:$0xff]   ;;  %v3313_v39 = vld [vmem:[#allocation11] sm:$0xff]   ;;  %v3316_v42 = vld [vmem:[%s3925_s13 + $0x8] sm:$0xff]  }
  0x97   : > { %3004 = vmatpush3.bf16.msra.mxu0 %v3277_v3  ;;  %3152 = vmatpush3.bf16.msra.mxu1 %v3277_v3  ;;  %v3314_v40 = vld [vmem:[%s3925_s13] sm:$0xff]   ;;  %v3317_v43 = vld [vmem:[%s3932_s25 + $0x8] sm:$0xff]   ;;  %v3318_v44 = vld [vmem:[%s3925_s13 + $0x10] sm:$0xff]  }
  0x98   : > { %3005 = vmatprep.subr.bf16.mxu0 %v3278_v6  ;;  %3145 = vmatprep.subr.bf16.mxu1 %v3278_v6  ;;  %v3315_v41 = vld [vmem:[%s3932_s25] sm:$0xff]   ;;  %v3319_v45 = vld [vmem:[%s3932_s25 + $0x10] sm:$0xff]   ;;  %v3320_v46 = vld [vmem:[%s3925_s13 + $0x18] sm:$0xff]  }
  0x99   : > { %v3321_v47 = vld [vmem:[%s3932_s25 + $0x18] sm:$0xff]   ;;  %v3322_v48 = vld [vmem:[%s3925_s13 + $0x20] sm:$0xff]   ;;  %v3324_v50 = vld [vmem:[%s3925_s13 + $0x28] sm:$0xff]  }
  0x9a   : > { %v3323_v49 = vld [vmem:[%s3932_s25 + $0x20] sm:$0xff]   ;;  %v3325_v51 = vld [vmem:[%s3932_s25 + $0x28] sm:$0xff]   ;;  %v3326_v52 = vld [vmem:[%s3925_s13 + $0x30] sm:$0xff]  }
  0x9b   : > { %3006 = vmatpush3.bf16.msra.mxu0 %v3278_v6  ;;  %3153 = vmatpush3.bf16.msra.mxu1 %v3278_v6  ;;  %v3327_v53 = vld [vmem:[%s3932_s25 + $0x30] sm:$0xff]   ;;  %v3328_v54 = vld [vmem:[%s3925_s13 + $0x38] sm:$0xff]   ;;  %v3330_v56 = vld [vmem:[%s3925_s13 + $0x40] sm:$0xff]  }
  0x9c   : > { %3007 = vmatprep.subr.bf16.mxu0 %v3279_v7  ;;  %3146 = vmatprep.subr.bf16.mxu1 %v3279_v7  ;;  %v3329_v55 = vld [vmem:[%s3932_s25 + $0x38] sm:$0xff]   ;;  %v3331_v57 = vld [vmem:[%s3932_s25 + $0x40] sm:$0xff]   ;;  %v3332_v58 = vld [vmem:[%s3925_s13 + $0x48] sm:$0xff]  }
  0x9d   : > { %v3333_v59 = vld [vmem:[%s3932_s25 + $0x48] sm:$0xff]   ;;  %v3334_v60 = vld [vmem:[%s3925_s13 + $0x50] sm:$0xff]   ;;  %v3336_v62 = vld [vmem:[%s3925_s13 + $0x58] sm:$0xff]  }
  0x9e   : > { %v3335_v61 = vld [vmem:[%s3932_s25 + $0x50] sm:$0xff]   ;;  %v3337_v63 = vld [vmem:[%s3932_s25 + $0x58] sm:$0xff]   ;;  %v3338_v0 = vld [vmem:[%s3925_s13 + $0x60] sm:$0xff]  }
  0x9f   : > { %3008 = vmatpush3.bf16.msra.mxu0 %v3279_v7  ;;  %3154 = vmatpush3.bf16.msra.mxu1 %v3279_v7  ;;  %v3339_v1 = vld [vmem:[%s3932_s25 + $0x60] sm:$0xff]   ;;  %v3340_v2 = vld [vmem:[%s3925_s13 + $0x68] sm:$0xff]   ;;  %v3342_v4 = vld [vmem:[%s3925_s13 + $0x70] sm:$0xff]  }
  0xa0   : > { %3009 = vmatprep.subr.bf16.mxu0 %v3280_v8  ;;  %3147 = vmatprep.subr.bf16.mxu1 %v3280_v8  ;;  %v3341_v3 = vld [vmem:[%s3932_s25 + $0x68] sm:$0xff]   ;;  %v3343_v5 = vld [vmem:[%s3932_s25 + $0x70] sm:$0xff]   ;;  %v3344_v6 = vld [vmem:[%s3925_s13 + $0x78] sm:$0xff]  }
  0xa1   : > { %v3345_v7 = vld [vmem:[%s3932_s25 + $0x78] sm:$0xff]  }
  0xa3   : > { %3010 = vmatpush3.bf16.msra.mxu0 %v3280_v8  ;;  %3155 = vmatpush3.bf16.msra.mxu1 %v3280_v8 }
  0xa4   : > { %3011 = vmatprep.subr.bf16.mxu0 %v3281_v9  ;;  %3148 = vmatprep.subr.bf16.mxu1 %v3281_v9 }
  0xa7   : > { %3012 = vmatpush3.bf16.msra.mxu0 %v3281_v9  ;;  %3156 = vmatpush3.bf16.msra.mxu1 %v3281_v9 }
  0xa8   : > { %3045 = vmatprep.subr.bf16.mxu1 %v3286_v10  ;;  %3093 = vmatprep.subr.bf16.mxu0 %v3287_v12 }
  0xaa   : > { %3014 = vmatmul.mubr.bf16.vlgmr.msra.gmra.mxu0 %v3284_v11  ;;  %3030 = vmatmul.mubr.bf16.vlgmr.msra.gmra.mxu1 %v3285_v13 }
  0xab   : > { %3046 = vmatpush3.bf16.msra.mxu1 %v3286_v10  ;;  %3094 = vmatpush3.bf16.msra.mxu0 %v3287_v12 }
  0xac   : > { %3047 = vmatprep.subr.bf16.mxu1 %v3288_v14  ;;  %3095 = vmatprep.subr.bf16.mxu0 %v3289_v15 }
  0xad   : > { %3017 = vmatprep.mubr.bf16.mxu0 %v3290_v16  ;;  %3033 = vmatprep.mubr.bf16.mxu1 %v3291_v17 }
  0xaf   : > { %3048 = vmatpush3.bf16.msra.mxu1 %v3288_v14  ;;  %3096 = vmatpush3.bf16.msra.mxu0 %v3289_v15 }
  0xb0   : > { %3049 = vmatprep.subr.bf16.mxu1 %v3294_v18  ;;  %3097 = vmatprep.subr.bf16.mxu0 %v3295_v20 }
  0xb2   : > { %3018 = vmatmul.mubr.bf16.gmra.mxu0 %v3292_v19  ;;  %3034 = vmatmul.mubr.bf16.gmra.mxu1 %v3293_v21 }
  0xb3   : > { %3050 = vmatpush3.bf16.msra.mxu1 %v3294_v18  ;;  %3098 = vmatpush3.bf16.msra.mxu0 %v3295_v20 }
  0xb4   : > { %3051 = vmatprep.subr.bf16.mxu1 %v3296_v22  ;;  %3099 = vmatprep.subr.bf16.mxu0 %v3297_v23 }
  0xb5   : > { %3021 = vmatprep.mubr.bf16.mxu0 %v3298_v24  ;;  %3037 = vmatprep.mubr.bf16.mxu1 %v3299_v25 }
  0xb7   : > { %3052 = vmatpush3.bf16.msra.mxu1 %v3296_v22  ;;  %3100 = vmatpush3.bf16.msra.mxu0 %v3297_v23 }
  0xb8   : > { %3053 = vmatprep.subr.bf16.mxu1 %v3302_v26  ;;  %3101 = vmatprep.subr.bf16.mxu0 %v3303_v28 }
  0xba   : > { %3022 = vmatmul.mubr.bf16.gmra.mxu0 %v3300_v27  ;;  %3038 = vmatmul.mubr.bf16.gmra.mxu1 %v3301_v29 }
  0xbb   : > { %3054 = vmatpush3.bf16.msra.mxu1 %v3302_v26  ;;  %3102 = vmatpush3.bf16.msra.mxu0 %v3303_v28 }
  0xbc   : > { %3055 = vmatprep.subr.bf16.mxu1 %v3304_v30  ;;  %3103 = vmatprep.subr.bf16.mxu0 %v3305_v31 }
  0xbd   : > { %3025 = vmatprep.mubr.bf16.mxu0 %v3306_v32  ;;  %3041 = vmatprep.mubr.bf16.mxu1 %v3307_v33 }
  0xbf   : > { %3056 = vmatpush3.bf16.msra.mxu1 %v3304_v30  ;;  %3104 = vmatpush3.bf16.msra.mxu0 %v3305_v31 }
  0xc0   : > { %3057 = vmatprep.subr.bf16.mxu1 %v3310_v34  ;;  %3105 = vmatprep.subr.bf16.mxu0 %v3311_v36 }
  0xc2   : > { %3026 = vmatmul.mubr.bf16.gmra.mxu0 %v3308_v35  ;;  %3042 = vmatmul.mubr.bf16.gmra.mxu1 %v3309_v37 }
  0xc3   : > { %3058 = vmatpush3.bf16.msra.mxu1 %v3310_v34  ;;  %3106 = vmatpush3.bf16.msra.mxu0 %v3311_v36 }
  0xc4   : > { %3059 = vmatprep.subr.bf16.mxu1 %v3312_v38  ;;  %3107 = vmatprep.subr.bf16.mxu0 %v3313_v39 }
  0xc5   : > { %3061 = vmatprep.mubr.bf16.mxu1 %v3314_v40  ;;  %3109 = vmatprep.mubr.bf16.mxu0 %v3315_v41 }
  0xc7   : > { %3060 = vmatpush3.bf16.msra.mxu1 %v3312_v38  ;;  %3108 = vmatpush3.bf16.msra.mxu0 %v3313_v39 }
  0xca   : > { %3062 = vmatmul.mubr.bf16.vlgmr.msra.gmra.mxu1 %v3316_v42  ;;  %3110 = vmatmul.mubr.bf16.vlgmr.msra.gmra.mxu0 %v3317_v43 }
  0xcb   : > { %3065 = vmatprep.mubr.bf16.mxu1 %v3318_v44  ;;  %3113 = vmatprep.mubr.bf16.mxu0 %v3319_v45 }
  0xd2   : > { %3066 = vmatmul.mubr.bf16.gmra.mxu1 %v3320_v46  ;;  %3114 = vmatmul.mubr.bf16.gmra.mxu0 %v3321_v47 }
  0xd3   : > { %3069 = vmatprep.mubr.bf16.mxu1 %v3322_v48  ;;  %3117 = vmatprep.mubr.bf16.mxu0 %v3323_v49 }
  0xda   : > { %3070 = vmatmul.mubr.bf16.gmra.mxu1 %v3324_v50  ;;  %3118 = vmatmul.mubr.bf16.gmra.mxu0 %v3325_v51 }
  0xdb   : > { %3073 = vmatprep.mubr.bf16.mxu1 %v3326_v52  ;;  %3121 = vmatprep.mubr.bf16.mxu0 %v3327_v53 }
  0xe2   : > { %3074 = vmatmul.mubr.bf16.gmra.mxu1 %v3328_v54  ;;  %3122 = vmatmul.mubr.bf16.gmra.mxu0 %v3329_v55 }
  0xe3   : > { %3077 = vmatprep.mubr.bf16.mxu1 %v3330_v56  ;;  %3125 = vmatprep.mubr.bf16.mxu0 %v3331_v57 }
  0xea   : > { %3078 = vmatmul.mubr.bf16.gmra.mxu1 %v3332_v58  ;;  %3126 = vmatmul.mubr.bf16.gmra.mxu0 %v3333_v59 }
  0xeb   : > { %3081 = vmatprep.mubr.bf16.mxu1 %v3334_v60  ;;  %3129 = vmatprep.mubr.bf16.mxu0 %v3335_v61 }
  0xf2   : > { %3082 = vmatmul.mubr.bf16.gmra.mxu1 %v3336_v62  ;;  %3130 = vmatmul.mubr.bf16.gmra.mxu0 %v3337_v63 }
  0xf3   : > { %3085 = vmatprep.mubr.bf16.mxu1 %v3338_v0  ;;  %3133 = vmatprep.mubr.bf16.mxu0 %v3339_v1 }
  0xfa   : > { %3086 = vmatmul.mubr.bf16.gmra.mxu1 %v3340_v2  ;;  %3134 = vmatmul.mubr.bf16.gmra.mxu0 %v3341_v3 }
  0xfb   : > { %3089 = vmatprep.mubr.bf16.mxu1 %v3342_v4  ;;  %3137 = vmatprep.mubr.bf16.mxu0 %v3343_v5 }
 0x102   : > { %3090 = vmatmul.mubr.bf16.gmra.mxu1 %v3344_v6  ;;  %3138 = vmatmul.mubr.bf16.gmra.mxu0 %v3345_v7 }
 0x16a   : > { %v3015_v8 = vpop.f32.mrf.mxu0  ;;  %v3031_v9 = vpop.f32.mrf.mxu1 }
 0x16c   : > { %v726_v10 = vpop.f32.mrf.mxu0  ;;  %v790_v11 = vpop.f32.mrf.mxu1 }
 0x16e   : > { %v3016_v12 = vpop.f32.mrf.mxu0  ;;  %v3032_v13 = vpop.f32.mrf.mxu1 }
 0x16f   : > { %v2648_v14 = vpack.c.bf16 %v3016_v12, %v3015_v8  ;;  %v2688_v15 = vpack.c.bf16 %v3032_v13, %v3031_v9 }
 0x170   : > { %v729_v16 = vpop.f32.mrf.mxu0  ;;  %v793_v17 = vpop.f32.mrf.mxu1 }
 0x171   : > { %2880 = vst [vmem:[%s3991_s14 + $0x8] sm:$0xff] %v2648_v14   ;;  %2888 = vst [vmem:[%s3991_s14 + $0x48] sm:$0xff] %v2688_v15   ;;  %v2643_v18 = vpack.c.bf16 %v729_v16, %v726_v10  ;;  %v2683_v19 = vpack.c.bf16 %v793_v17, %v790_v11 }
 0x172   : > { %v3019_v20 = vpop.f32.mrf.mxu0  ;;  %v3035_v21 = vpop.f32.mrf.mxu1 }
 0x173   : > { %2644 = vst [vmem:[%s3991_s14] sm:$0xff] %v2643_v18   ;;  %2887 = vst [vmem:[%s3991_s14 + $0x40] sm:$0xff] %v2683_v19  }
 0x174   : > { %v742_v22 = vpop.f32.mrf.mxu0  ;;  %v806_v23 = vpop.f32.mrf.mxu1 }
 0x176   : > { %v3020_v24 = vpop.f32.mrf.mxu0  ;;  %v3036_v25 = vpop.f32.mrf.mxu1 }
 0x177   : > { %v2658_v26 = vpack.c.bf16 %v3020_v24, %v3019_v20  ;;  %v2698_v27 = vpack.c.bf16 %v3036_v25, %v3035_v21 }
 0x178   : > { %v745_v28 = vpop.f32.mrf.mxu0  ;;  %v809_v29 = vpop.f32.mrf.mxu1 }
 0x179   : > { %2882 = vst [vmem:[%s3991_s14 + $0x18] sm:$0xff] %v2658_v26   ;;  %2890 = vst [vmem:[%s3991_s14 + $0x58] sm:$0xff] %v2698_v27   ;;  %v2653_v30 = vpack.c.bf16 %v745_v28, %v742_v22  ;;  %v2693_v31 = vpack.c.bf16 %v809_v29, %v806_v23 }
 0x17a   : > { %v3023_v32 = vpop.f32.mrf.mxu0  ;;  %v3039_v33 = vpop.f32.mrf.mxu1 }
 0x17b   : > { %2881 = vst [vmem:[%s3991_s14 + $0x10] sm:$0xff] %v2653_v30   ;;  %2889 = vst [vmem:[%s3991_s14 + $0x50] sm:$0xff] %v2693_v31  }
 0x17c   : > { %v758_v34 = vpop.f32.mrf.mxu0  ;;  %v822_v35 = vpop.f32.mrf.mxu1 }
 0x17e   : > { %v3024_v36 = vpop.f32.mrf.mxu0  ;;  %v3040_v37 = vpop.f32.mrf.mxu1 }
 0x17f   : > { %v2668_v38 = vpack.c.bf16 %v3024_v36, %v3023_v32  ;;  %v2708_v39 = vpack.c.bf16 %v3040_v37, %v3039_v33 }
 0x180   : > { %v761_v40 = vpop.f32.mrf.mxu0  ;;  %v825_v41 = vpop.f32.mrf.mxu1 }
 0x181   : > { %2884 = vst [vmem:[%s3991_s14 + $0x28] sm:$0xff] %v2668_v38   ;;  %2892 = vst [vmem:[%s3991_s14 + $0x68] sm:$0xff] %v2708_v39   ;;  %v2663_v42 = vpack.c.bf16 %v761_v40, %v758_v34  ;;  %v2703_v43 = vpack.c.bf16 %v825_v41, %v822_v35 }
 0x182   : > { %v3027_v44 = vpop.f32.mrf.mxu0  ;;  %v3043_v45 = vpop.f32.mrf.mxu1 }
 0x183   : > { %2883 = vst [vmem:[%s3991_s14 + $0x20] sm:$0xff] %v2663_v42   ;;  %2891 = vst [vmem:[%s3991_s14 + $0x60] sm:$0xff] %v2703_v43  }
 0x184   : > { %v774_v46 = vpop.f32.mrf.mxu0  ;;  %v838_v47 = vpop.f32.mrf.mxu1 }
 0x186   : > { %v3028_v48 = vpop.f32.mrf.mxu0  ;;  %v3044_v49 = vpop.f32.mrf.mxu1 }
 0x187   : > { %v2678_v50 = vpack.c.bf16 %v3028_v48, %v3027_v44  ;;  %v2718_v51 = vpack.c.bf16 %v3044_v49, %v3043_v45 }
 0x188   : > { %v777_v52 = vpop.f32.mrf.mxu0  ;;  %v841_v53 = vpop.f32.mrf.mxu1 }
 0x189   : > { %2886 = vst [vmem:[%s3991_s14 + $0x38] sm:$0xff] %v2678_v50   ;;  %2894 = vst [vmem:[%s3991_s14 + $0x78] sm:$0xff] %v2718_v51   ;;  %v2673_v54 = vpack.c.bf16 %v777_v52, %v774_v46  ;;  %v2713_v55 = vpack.c.bf16 %v841_v53, %v838_v47 }
 0x18a   : > { %v3063_v56 = vpop.f32.mrf.mxu1  ;;  %v3111_v57 = vpop.f32.mrf.mxu0 }
 0x18b   : > { %2885 = vst [vmem:[%s3991_s14 + $0x30] sm:$0xff] %v2673_v54   ;;  %2893 = vst [vmem:[%s3991_s14 + $0x70] sm:$0xff] %v2713_v55  }
 0x18c   : > { %v1239_v58 = vpop.f32.mrf.mxu1  ;;  %v1752_v59 = vpop.f32.mrf.mxu0 }
 0x18d   : > { %3521 = shalt.err (!%p3518_p11)
}
 0x18e   : > { %s3522_s3 = scalar_lea.hbm %s4015_s24, 2048  ;;  %s3526_s12 = scalar_lea.hbm %s4186_s6, 4096 }
 0x18f   : > { %p3523_p9 = scmp.ne.s32.totalorder %s4015_s24, %s3522_s3  ;;  %p3527_p0 = scmp.lt.s32.totalorder %s4015_s24, %s4186_s6 }
 0x190   : > { %p3528_p13 = scmp.lt.s32.totalorder %s3526_s12, %s3522_s3 }
 0x191   : > { %p3524_p1 = pnand %p3523_p9, %p4235_p4 }
 0x192   : > { %p3529_p6 = por %p3528_p13, %p3527_p0 }
 0x193   : > { %p3525_p12 = pneg %p3524_p1 }
 0x195   : > { %p3530_p8 = pnand %p3529_p6, %p3525_p12 }
 0x197   : > { %3533 = shalt.err (!%p3530_p8)
}
 0x198   : > { %s3667_s25 = smov 64   ;;  %s3668_s14 = smov 4   ;;  %v3064_v60 = vpop.f32.mrf.mxu1  ;;  %v3112_v61 = vpop.f32.mrf.mxu0 }
 0x199   : > { %3175 = dma.vmem_to_hbm [thread:$0]  (%p4235_p4), %s4017_s20, 2048, %s4015_s24, %s2040_s30, %s3667_s25, %s3667_s25, %s3668_s14   ;;  %v2728_v62 = vpack.c.bf16 %v3064_v60, %v3063_v56  ;;  %v2808_v63 = vpack.c.bf16 %v3112_v61, %v3111_v57 }
 0x19a   : > { %v1242_v0 = vpop.f32.mrf.mxu1  ;;  %v1755_v1 = vpop.f32.mrf.mxu0  ;;  %s4048_s26 = scalar_lea.vmem [#allocation14], %s3911_s27  ;;  %s4052_s18 = scalar_lea.vmem [#allocation16], %s3911_s27 }
 0x19b   : > { %2895 = vst [vmem:[%s4048_s26 + $0x8] sm:$0xff] %v2728_v62   ;;  %2910 = vst [vmem:[%s4052_s18 + $0x8] sm:$0xff] %v2808_v63   ;;  %v2723_v2 = vpack.c.bf16 %v1242_v0, %v1239_v58  ;;  %v2803_v3 = vpack.c.bf16 %v1755_v1, %v1752_v59  ;;  %s2083_s8 = sshll.u32 %s4048_s26, 4  ;;  %s2101_s27 = sshll.u32 %s4052_s18, 4  ;;  %s4091_s8 = int_to_ptr.vmem [resolvable:$true] %s2083_s8  ;;  %s4099_s27 = int_to_ptr.vmem [resolvable:$true] %s2101_s27 }
 0x19c   : > { %v3067_v4 = vpop.f32.mrf.mxu1  ;;  %v3115_v5 = vpop.f32.mrf.mxu0  ;;  %s4236_s30 = sld [smem:[#allocation30_spill]]  ;;  %s4105_s9 = scalar_lea.sflag [#allocation15], %s415_s7 }
 0x19d   : > { %2724 = vst [vmem:[%s4048_s26] sm:$0xff] %v2723_v2   ;;  %2804 = vst [vmem:[%s4052_s18] sm:$0xff] %v2803_v3   ;;  %s4238_s3 = sld [smem:[#allocation31_spill]]  ;;  %s3534_s12 = scalar_lea.vmem %s4091_s8, 2048 }
 0x19e   : > { %v1255_v6 = vpop.f32.mrf.mxu1  ;;  %v1768_v7 = vpop.f32.mrf.mxu0  ;;  %p3535_p3 = scmp.ne.s32.totalorder %s4091_s8, %s3534_s12  ;;  %s3669_s17 = smov [#allocation14]  }
 0x19f   : > { %s3538_s13 = sshll.u32 %s3669_s17, 4  ;;  %s3539_s13 = int_to_ptr.vmem [resolvable:$false] %s3538_s13 }
 0x1a0   : > { %v3068_v8 = vpop.f32.mrf.mxu1  ;;  %v3116_v9 = vpop.f32.mrf.mxu0  ;;  %p3536_p10 = pnand %p3535_p3, %p4235_p4  ;;  %s3540_s20 = scalar_lea.vmem %s3539_s13, 4096 }
 0x1a1   : > { %v2738_v10 = vpack.c.bf16 %v3068_v8, %v3067_v4  ;;  %v2818_v11 = vpack.c.bf16 %v3116_v9, %v3115_v5  ;;  %p3541_p5 = scmp.lt.s32.totalorder %s4091_s8, %s3539_s13  ;;  %p3542_p7 = scmp.lt.s32.totalorder %s3540_s20, %s3534_s12 }
 0x1a2   : > { %v1258_v12 = vpop.f32.mrf.mxu1  ;;  %v1771_v13 = vpop.f32.mrf.mxu0  ;;  %s4237_s21 = smov %s4236_s30  ;;  %s4089_s16 = scalar_lea.hbm %s4236_s30, %s4006_s19 }
 0x1a3   : > { %2897 = vst [vmem:[%s4048_s26 + $0x18] sm:$0xff] %v2738_v10   ;;  %2912 = vst [vmem:[%s4052_s18 + $0x18] sm:$0xff] %v2818_v11   ;;  %v2733_v14 = vpack.c.bf16 %v1258_v12, %v1255_v6  ;;  %v2813_v15 = vpack.c.bf16 %v1771_v13, %v1768_v7  ;;  %s4097_s22 = scalar_lea.hbm %s4238_s3, %s4006_s19  ;;  %p3537_p2 = pneg %p3536_p10 }
 0x1a4   : > { %v3071_v16 = vpop.f32.mrf.mxu1  ;;  %v3119_v17 = vpop.f32.mrf.mxu0  ;;  %p3543_p11 = por %p3542_p7, %p3541_p5 }
 0x1a5   : > { %2896 = vst [vmem:[%s4048_s26 + $0x10] sm:$0xff] %v2733_v14   ;;  %2911 = vst [vmem:[%s4052_s18 + $0x10] sm:$0xff] %v2813_v15  }
 0x1a6   : > { %v1271_v18 = vpop.f32.mrf.mxu1  ;;  %v1784_v19 = vpop.f32.mrf.mxu0  ;;  %p3544_p9 = pnand %p3543_p11, %p3537_p2 }
 0x1a8   : > { %v3072_v20 = vpop.f32.mrf.mxu1  ;;  %v3120_v21 = vpop.f32.mrf.mxu0 }
 0x1a9   : > { %v2748_v22 = vpack.c.bf16 %v3072_v20, %v3071_v16  ;;  %v2828_v23 = vpack.c.bf16 %v3120_v21, %v3119_v17 }
 0x1aa   : > { %v1274_v24 = vpop.f32.mrf.mxu1  ;;  %v1787_v25 = vpop.f32.mrf.mxu0 }
 0x1ab   : > { %2899 = vst [vmem:[%s4048_s26 + $0x28] sm:$0xff] %v2748_v22   ;;  %2914 = vst [vmem:[%s4052_s18 + $0x28] sm:$0xff] %v2828_v23   ;;  %v2743_v26 = vpack.c.bf16 %v1274_v24, %v1271_v18  ;;  %v2823_v27 = vpack.c.bf16 %v1787_v25, %v1784_v19 }
 0x1ac   : > { %v3075_v28 = vpop.f32.mrf.mxu1  ;;  %v3123_v29 = vpop.f32.mrf.mxu0 }
 0x1ad   : > { %2898 = vst [vmem:[%s4048_s26 + $0x20] sm:$0xff] %v2743_v26   ;;  %2913 = vst [vmem:[%s4052_s18 + $0x20] sm:$0xff] %v2823_v27  }
 0x1ae   : > { %v1287_v30 = vpop.f32.mrf.mxu1  ;;  %v1800_v31 = vpop.f32.mrf.mxu0 }
 0x1b0   : > { %v3076_v32 = vpop.f32.mrf.mxu1  ;;  %v3124_v33 = vpop.f32.mrf.mxu0 }
 0x1b1   : > { %v2758_v34 = vpack.c.bf16 %v3076_v32, %v3075_v28  ;;  %v2838_v35 = vpack.c.bf16 %v3124_v33, %v3123_v29 }
 0x1b2   : > { %v1290_v36 = vpop.f32.mrf.mxu1  ;;  %v1803_v37 = vpop.f32.mrf.mxu0 }
 0x1b3   : > { %2901 = vst [vmem:[%s4048_s26 + $0x38] sm:$0xff] %v2758_v34   ;;  %2916 = vst [vmem:[%s4052_s18 + $0x38] sm:$0xff] %v2838_v35   ;;  %v2753_v38 = vpack.c.bf16 %v1290_v36, %v1287_v30  ;;  %v2833_v39 = vpack.c.bf16 %v1803_v37, %v1800_v31 }
 0x1b4   : > { %v3079_v40 = vpop.f32.mrf.mxu1  ;;  %v3127_v41 = vpop.f32.mrf.mxu0 }
 0x1b5   : > { %2900 = vst [vmem:[%s4048_s26 + $0x30] sm:$0xff] %v2753_v38   ;;  %2915 = vst [vmem:[%s4052_s18 + $0x30] sm:$0xff] %v2833_v39  }
 0x1b6   : > { %v1303_v42 = vpop.f32.mrf.mxu1  ;;  %v1816_v43 = vpop.f32.mrf.mxu0 }
 0x1b8   : > { %v3080_v44 = vpop.f32.mrf.mxu1  ;;  %v3128_v45 = vpop.f32.mrf.mxu0 }
 0x1b9   : > { %v2768_v46 = vpack.c.bf16 %v3080_v44, %v3079_v40  ;;  %v2848_v47 = vpack.c.bf16 %v3128_v45, %v3127_v41 }
 0x1ba   : > { %v1306_v48 = vpop.f32.mrf.mxu1  ;;  %v1819_v49 = vpop.f32.mrf.mxu0 }
 0x1bb   : > { %2903 = vst [vmem:[%s4048_s26 + $0x48] sm:$0xff] %v2768_v46   ;;  %2918 = vst [vmem:[%s4052_s18 + $0x48] sm:$0xff] %v2848_v47   ;;  %v2763_v50 = vpack.c.bf16 %v1306_v48, %v1303_v42  ;;  %v2843_v51 = vpack.c.bf16 %v1819_v49, %v1816_v43 }
 0x1bc   : > { %v3083_v52 = vpop.f32.mrf.mxu1  ;;  %v3131_v53 = vpop.f32.mrf.mxu0 }
 0x1bd   : > { %2902 = vst [vmem:[%s4048_s26 + $0x40] sm:$0xff] %v2763_v50   ;;  %2917 = vst [vmem:[%s4052_s18 + $0x40] sm:$0xff] %v2843_v51  }
 0x1be   : > { %v1319_v54 = vpop.f32.mrf.mxu1  ;;  %v1832_v55 = vpop.f32.mrf.mxu0 }
 0x1c0   : > { %v3084_v56 = vpop.f32.mrf.mxu1  ;;  %v3132_v57 = vpop.f32.mrf.mxu0 }
 0x1c1   : > { %v2778_v58 = vpack.c.bf16 %v3084_v56, %v3083_v52  ;;  %v2858_v59 = vpack.c.bf16 %v3132_v57, %v3131_v53 }
 0x1c2   : > { %v1322_v60 = vpop.f32.mrf.mxu1  ;;  %v1835_v61 = vpop.f32.mrf.mxu0 }
 0x1c3   : > { %2905 = vst [vmem:[%s4048_s26 + $0x58] sm:$0xff] %v2778_v58   ;;  %2920 = vst [vmem:[%s4052_s18 + $0x58] sm:$0xff] %v2858_v59   ;;  %v2773_v62 = vpack.c.bf16 %v1322_v60, %v1319_v54  ;;  %v2853_v63 = vpack.c.bf16 %v1835_v61, %v1832_v55 }
 0x1c4   : > { %v3087_v0 = vpop.f32.mrf.mxu1  ;;  %v3135_v1 = vpop.f32.mrf.mxu0 }
 0x1c5   : > { %2904 = vst [vmem:[%s4048_s26 + $0x50] sm:$0xff] %v2773_v62   ;;  %2919 = vst [vmem:[%s4052_s18 + $0x50] sm:$0xff] %v2853_v63  }
 0x1c6   : > { %v1335_v2 = vpop.f32.mrf.mxu1  ;;  %v1848_v3 = vpop.f32.mrf.mxu0 }
 0x1c8   : > { %v3088_v4 = vpop.f32.mrf.mxu1  ;;  %v3136_v5 = vpop.f32.mrf.mxu0 }
 0x1c9   : > { %v2788_v6 = vpack.c.bf16 %v3088_v4, %v3087_v0  ;;  %v2868_v7 = vpack.c.bf16 %v3136_v5, %v3135_v1 }
 0x1ca   : > { %v1338_v8 = vpop.f32.mrf.mxu1  ;;  %v1851_v9 = vpop.f32.mrf.mxu0 }
 0x1cb   : > { %2907 = vst [vmem:[%s4048_s26 + $0x68] sm:$0xff] %v2788_v6   ;;  %2922 = vst [vmem:[%s4052_s18 + $0x68] sm:$0xff] %v2868_v7   ;;  %v2783_v10 = vpack.c.bf16 %v1338_v8, %v1335_v2  ;;  %v2863_v11 = vpack.c.bf16 %v1851_v9, %v1848_v3 }
 0x1cc   : > { %v3091_v12 = vpop.f32.mrf.mxu1  ;;  %v3139_v13 = vpop.f32.mrf.mxu0 }
 0x1cd   : > { %2906 = vst [vmem:[%s4048_s26 + $0x60] sm:$0xff] %v2783_v10   ;;  %2921 = vst [vmem:[%s4052_s18 + $0x60] sm:$0xff] %v2863_v11  }
 0x1ce   : > { %v1351_v14 = vpop.f32.mrf.mxu1  ;;  %v1864_v15 = vpop.f32.mrf.mxu0 }
 0x1d0   : > { %v3092_v16 = vpop.f32.mrf.mxu1  ;;  %v3140_v17 = vpop.f32.mrf.mxu0 }
 0x1d1   : > { %v2798_v18 = vpack.c.bf16 %v3092_v16, %v3091_v12  ;;  %v2878_v19 = vpack.c.bf16 %v3140_v17, %v3139_v13 }
 0x1d2   : > { %v1354_v20 = vpop.f32.mrf.mxu1  ;;  %v1867_v21 = vpop.f32.mrf.mxu0 }
 0x1d3   : > { %2909 = vst [vmem:[%s4048_s26 + $0x78] sm:$0xff] %v2798_v18   ;;  %2924 = vst [vmem:[%s4052_s18 + $0x78] sm:$0xff] %v2878_v19   ;;  %v2793_v22 = vpack.c.bf16 %v1354_v20, %v1351_v14  ;;  %v2873_v23 = vpack.c.bf16 %v1867_v21, %v1864_v15 }
 0x1d5   : > { %2908 = vst [vmem:[%s4048_s26 + $0x70] sm:$0xff] %v2793_v22   ;;  %2923 = vst [vmem:[%s4052_s18 + $0x70] sm:$0xff] %v2873_v23  }
 0x1d6   : > { %3547 = shalt.err (!%p3544_p9)
}
 0x1d7   : > { %s3548_s11 = scalar_lea.hbm %s4089_s16, 2048  ;;  %s3552_s26 = scalar_lea.hbm %s4237_s21, 4096 }
 0x1d8   : > { %p3549_p1 = scmp.ne.s32.totalorder %s4089_s16, %s3548_s11  ;;  %p3553_p13 = scmp.lt.s32.totalorder %s4089_s16, %s4237_s21 }
 0x1d9   : > { %p3554_p6 = scmp.lt.s32.totalorder %s3552_s26, %s3548_s11 }
 0x1da   : > { %p3550_p12 = pnand %p3549_p1, %p4235_p4 }
 0x1db   : > { %p3555_p8 = por %p3554_p6, %p3553_p13 }
 0x1dc   : > { %p3551_p0 = pneg %p3550_p12 }
 0x1de   : > { %p3556_p3 = pnand %p3555_p8, %p3551_p0 }
 0x1e0   : > { %3559 = shalt.err (!%p3556_p3)
}
 0x1e1   : > { %3176 = dma.vmem_to_hbm [thread:$0]  (%p4235_p4), %s4091_s8, 2048, %s4089_s16, %s4105_s9, %s3667_s25, %s3667_s25, %s3668_s14  }
 0x1e2   : > { %s3560_s30 = scalar_lea.vmem %s4099_s27, 2048  ;;  %s3670_s1 = smov [#allocation16]  }
 0x1e3   : > { %p3561_p10 = scmp.ne.s32.totalorder %s4099_s27, %s3560_s30  ;;  %s3564_s4 = sshll.u32 %s3670_s1, 4  ;;  %s3565_s4 = int_to_ptr.vmem [resolvable:$false] %s3564_s4 }
 0x1e4   : > { %s3566_s12 = scalar_lea.vmem %s3565_s4, 4096  ;;  %p3567_p7 = scmp.lt.s32.totalorder %s4099_s27, %s3565_s4 }
 0x1e5   : > { %p3562_p2 = pnand %p3561_p10, %p4235_p4  ;;  %p3568_p11 = scmp.lt.s32.totalorder %s3566_s12, %s3560_s30 }
 0x1e7   : > { %p3563_p5 = pneg %p3562_p2  ;;  %p3569_p9 = por %p3568_p11, %p3567_p7 }
 0x1e9   : > { %p3570_p1 = pnand %p3569_p9, %p3563_p5 }
 0x1eb   : > { %3573 = shalt.err (!%p3570_p1)
}
 0x1ec   : > { %s3574_s17 = scalar_lea.hbm %s4097_s22, 2048  ;;  %s3578_s13 = scalar_lea.hbm %s4238_s3, 4096 }
 0x1ed   : > { %p3575_p12 = scmp.ne.s32.totalorder %s4097_s22, %s3574_s17  ;;  %p3579_p6 = scmp.lt.s32.totalorder %s4097_s22, %s4238_s3 }
 0x1ee   : > { %p3580_p8 = scmp.lt.s32.totalorder %s3578_s13, %s3574_s17 }
 0x1ef   : > { %p3576_p0 = pnand %p3575_p12, %p4235_p4 }
 0x1f0   : > { %p3581_p3 = por %p3580_p8, %p3579_p6 }
 0x1f1   : > { %p3577_p13 = pneg %p3576_p0 }
 0x1f3   : > { %p3582_p10 = pnand %p3581_p3, %p3577_p13 }
 0x1f5   : > { %3585 = shalt.err (!%p3582_p10)
}
 0x1f6   : > { %3177 = dma.vmem_to_hbm [thread:$0]  (%p4235_p4), %s4099_s27, 2048, %s4097_s22, %s4105_s9, %s3667_s25, %s3667_s25, %s3668_s14  }
 0x1f7 PF: > { %s4239_s7 = sld [smem:[#allocation23_spill]]  ;;  %p4242_p5 = scmp.ge.s32.totalorder %s3656_s10, 2 }
 0x1f8   : > { %s4240_s19 = sld [smem:[#allocation25_spill]] }
 0x1fd   : > { %s2116_s26 = sand.u32 1, %s4239_s7  }
 0x1fe   : > { %p4241_p2 = scmp.ne.s32.totalorder %s4240_s19, 0  ;;  %s2117_s18 = scalar_lea.sflag [#allocation4], %s2116_s26 }
 0x200   : > { %p3202_p7 = pnand %p4242_p5, %p4241_p2 }
 0x202   : > { %p3203_p11 = pneg %p3202_p7 }
 0x204   : > { %3627 = dma.done.wait (%p3203_p11), %s2117_s18, 2048  }
 0x205   : > { %3629 = vsyncadd (%p3203_p11), %s2117_s18, 4294965248  ;;  %s4243_s15 = sadd.s32 4294967294, %s3656_s10  }
 0x206   : > { %s2125_s24 = sand.u32 1, %s4243_s15  }
 0x207   : > { %s2126_s30 = scalar_lea.sflag [#allocation15], %s2125_s24 }
 0x208   : > { %3631 = dma.done.wait (%p3203_p11), %s2126_s30, 4096  }
 0x209   : > { %3633 = vsyncadd (%p3203_p11), %s2126_s30, 4294963200  ;;  %s33_s10 = sadd.s32 1, %s3656_s10   ;;  %s4244_s30 = sld [smem:[#allocation24_spill]] }
 0x20a   : > { %p30_p4 = scmp.ge.s32.totalorder %s33_s10, 4   ;;  %s4245_s9 = sld [smem:[#allocation26_spill]] }
 0x20b   : > { %s4246_s27 = smov %s3640_s28  ;;  %s4247_s28 = smov %s3644_s29 }
 0x20c   : > { %s4248_s29 = smov %s3834_s23  ;;  %32 = sbr.rel (!%p30_p4) target bundleno = 18 (0x12), region = 157 }
 0x211   :  { %2140 = vsyncpa [#allocation3], 1 }
 0x212   :  { %2142 = vsyncpa [#allocation3 + $0x1], 1 }
 0x213   :  { %2143 = vsyncpa [#allocation6], 1 }
 0x214   :  { %2145 = vsyncpa [#allocation6 + $0x1], 1 }
 0x215   :  { %2146 = vsyncpa [#allocation9], 1 }
 0x216   :  { %2147 = vsyncpa [#allocation12], 1 }
 0x217   :  { %2148 = vsyncpa [#allocation4], 1 }
 0x218   :  { %2150 = vsyncpa [#allocation4 + $0x1], 1 }
 0x219   :  { %2151 = vsyncpa [#allocation15], 1 }
 0x21a   :  { %2153 = vsyncpa [#allocation15 + $0x1], 1 }

</bundles_post_ra>
